<compile_context>
chip_gen: v7x
topology: tpu7x:2x2x1
jax: 0.10.0
libtpu: 0.0.40
codegen_flags: <defaults>
</compile_context>

<pallas_src>
import jax
import jax.numpy as jnp
from jax.experimental import pallas as pl
from jax.experimental.pallas import tpu as pltpu


def _round_up(n, m):
    return ((n + m - 1) // m) * m


def _discriminator_kernel(x_ref, w1_ref, b1_ref, w2_ref, b2_ref, w3_ref, b3_ref,
                          o_ref):
    """One batch tile: o[1, TB] = tanh(tanh(x@W1+b1)@W2+b2) . w3_row + b3."""
    x = x_ref[...]                                                    # [TB, D] f32
    h1 = jnp.tanh(
        jnp.dot(x, w1_ref[...], preferred_element_type=jnp.float32)
        + b1_ref[...])                                                # [TB, H]
    h2 = jnp.tanh(
        jnp.dot(h1, w2_ref[...], preferred_element_type=jnp.float32)
        + b2_ref[...])                                                # [TB, H]
    # Final layer (out_features == 1): VPU multiply + lane reduce instead of an
    # N=1 MXU matmul; produces a lane-dense [1, TB] output tile (no masked vst).
    logits = jnp.sum(h2 * w3_ref[...], axis=-1) + b3_ref[0]           # [TB]
    o_ref[...] = logits[None, :].astype(o_ref.dtype)                  # [1, TB]


def discriminator_forward(x, params, *, block_b=512):
    """x: [B, D] float32. params: w1[D,H], b1[1,H], w2[H,H], b2[1,H], w3[H,1], b3[1,1]."""
    B, D = x.shape
    H = params["w1"].shape[1]

    # Batch tile: single tile when it fits, otherwise a multiple of 128 so the
    # lane-dense output tile satisfies the (.,128) lane constraint.
    b8 = _round_up(B, 8)
    if b8 <= block_b:
        tb = b8
    else:
        tb = _round_up(block_b, 128)
    B_pad = _round_up(B, tb)
    n_tiles = B_pad // tb
    if B_pad != B:
        x = jnp.pad(x, ((0, B_pad - B), (0, 0)))

    w3_row = params["w3"].reshape(1, H)   # [H, 1] -> lane-aligned [1, H]
    b3_s = params["b3"].reshape(1)        # scalar bias -> SMEM

    cost = pl.CostEstimate(
        flops=2 * B_pad * (D * H + H * H + H),
        transcendentals=2 * B_pad * H,
        bytes_accessed=4 * (B_pad * D + D * H + H * H + 3 * H + 1 + B_pad),
    )

    out = pl.pallas_call(
        _discriminator_kernel,
        out_shape=jax.ShapeDtypeStruct((1, B_pad), jnp.float32),
        grid=(n_tiles,),
        in_specs=[
            pl.BlockSpec((tb, D), lambda i: (i, 0)),     # x: tiled over batch
            pl.BlockSpec((D, H), lambda i: (0, 0)),      # weights: VMEM-resident
            pl.BlockSpec((1, H), lambda i: (0, 0)),
            pl.BlockSpec((H, H), lambda i: (0, 0)),
            pl.BlockSpec((1, H), lambda i: (0, 0)),
            pl.BlockSpec((1, H), lambda i: (0, 0)),      # w3 as lane-aligned row
            pl.BlockSpec(memory_space=pltpu.MemorySpace.SMEM),  # b3 scalar
        ],
        out_specs=pl.BlockSpec((1, tb), lambda i: (0, i)),      # lane-dense output
        compiler_params=pltpu.CompilerParams(
            dimension_semantics=("parallel",),   # megacore sharding on v7x
            vmem_limit_bytes=48 * 1024 * 1024,   # budgeted for v7x's 64 MiB VMEM
        ),
        cost_estimate=cost,
    )(x, params["w1"], params["b1"], params["w2"], params["b2"], w3_row, b3_s)

    return out.reshape(B_pad, 1)[:B]


def init_params(key, num_inputs, hidden_size):
    """Mimics nn.Linear default init (U(-1/sqrt(fan_in), 1/sqrt(fan_in))) plus the
    module's in-place scaling of linear3 (weight*0.1, bias*0.0). Weights are stored
    pre-transposed as [in, out]."""
    k1, k2, k3, k4, k5 = jax.random.split(key, 5)

    def uni(k, shape, fan_in):
        bound = 1.0 / jnp.sqrt(jnp.float32(fan_in))
        return jax.random.uniform(k, shape, jnp.float32, -bound, bound)

    w1 = uni(k1, (num_inputs, hidden_size), num_inputs)
    b1 = uni(k2, (1, hidden_size), num_inputs)
    w2 = uni(k3, (hidden_size, hidden_size), hidden_size)
    b2 = uni(k4, (1, hidden_size), hidden_size)
    w3 = uni(k5, (hidden_size, 1), hidden_size) * 0.1   # .mul_(0.1)
    b3 = jnp.zeros((1, 1), jnp.float32)                 # .mul_(0.0)
    return {"w1": w1, "b1": b1, "w2": w2, "b2": b2, "w3": w3, "b3": b3}


def _reference_forward(x, p):
    h1 = jnp.tanh(x @ p["w1"] + p["b1"])
    h2 = jnp.tanh(h1 @ p["w2"] + p["b2"])
    return h2 @ p["w3"] + p["b3"]


if __name__ == "__main__":
    key = jax.random.PRNGKey(0)
    kx, kp = jax.random.split(key)

    B, D, H = 8, 16, 32          # small shapes: batch=8, num_inputs=16, hidden=32
    x = jax.random.normal(kx, (B, D), jnp.float32)
    params = init_params(kp, D, H)

    out = jax.jit(discriminator_forward)(x, params)
    out = jax.block_until_ready(out)

    ref = _reference_forward(x, params)
    assert out.shape == (B, 1)
    assert jnp.allclose(out, ref, atol=1e-5, rtol=1e-5)

    print("KERNEL_OK")
</pallas_src>

<mosaic_0001>
module attributes {stable_mosaic.version = 11 : i64} {
  func.func @_discriminator_kernel(%arg0: i32, %arg1: memref<8x16xf32, #tpu.memory_space<vmem>>, %arg2: memref<16x32xf32, #tpu.memory_space<vmem>>, %arg3: memref<1x32xf32, #tpu.memory_space<vmem>>, %arg4: memref<32x32xf32, #tpu.memory_space<vmem>>, %arg5: memref<1x32xf32, #tpu.memory_space<vmem>>, %arg6: memref<1x32xf32, #tpu.memory_space<vmem>>, %arg7: memref<1xf32, #tpu.memory_space<smem>>, %arg8: memref<1x8xf32, #tpu.memory_space<vmem>>) attributes {dimension_semantics = [#tpu.dimension_semantics<parallel>], iteration_bounds = array<i64: 1>, scalar_prefetch = 0 : i64, scratch_operands = 0 : i64, tpu.core_type = #tpu.core_type<tc>, window_params = [{transform_indices = @transform_0, window_bounds = array<i64: 8, 16>}, {pipeline_mode = #tpu.pipeline_mode<synchronous>, transform_indices = @transform_1, window_bounds = array<i64: 16, 32>}, {pipeline_mode = #tpu.pipeline_mode<synchronous>, transform_indices = @transform_2, window_bounds = array<i64: 1, 32>}, {pipeline_mode = #tpu.pipeline_mode<synchronous>, transform_indices = @transform_3, window_bounds = array<i64: 32, 32>}, {pipeline_mode = #tpu.pipeline_mode<synchronous>, transform_indices = @transform_4, window_bounds = array<i64: 1, 32>}, {pipeline_mode = #tpu.pipeline_mode<synchronous>, transform_indices = @transform_5, window_bounds = array<i64: 1, 32>}, {transform_indices = @transform_6, window_bounds = array<i64: 1>}, {transform_indices = @transform_7, window_bounds = array<i64: 1, 8>}]} {
    %c0 = arith.constant 0 : index
    %c0_0 = arith.constant 0 : index
    %0 = vector.load %arg1[%c0, %c0_0] : memref<8x16xf32, #tpu.memory_space<vmem>>, vector<8x16xf32>
    %c0_1 = arith.constant 0 : index
    %c0_2 = arith.constant 0 : index
    %1 = vector.load %arg2[%c0_1, %c0_2] : memref<16x32xf32, #tpu.memory_space<vmem>>, vector<16x32xf32>
    %cst = arith.constant dense<0.000000e+00> : vector<8x32xf32>
    %2 = tpu.matmul %0, %1, %cst {dimension_numbers = #tpu.dot_dimension_numbers<[1], [0], [0], [1], [0, 0, 1, 1], [], []>} : vector<8x16xf32>, vector<16x32xf32>, vector<8x32xf32> -> vector<8x32xf32>
    %c0_3 = arith.constant 0 : index
    %c0_4 = arith.constant 0 : index
    %3 = vector.load %arg3[%c0_3, %c0_4] : memref<1x32xf32, #tpu.memory_space<vmem>>, vector<1x32xf32>
    %4 = vector.broadcast %3 : vector<1x32xf32> to vector<8x32xf32>
    %5 = arith.addf %2, %4 : vector<8x32xf32>
    %6 = math.tanh %5 : vector<8x32xf32>
    %c0_5 = arith.constant 0 : index
    %c0_6 = arith.constant 0 : index
    %7 = vector.load %arg4[%c0_5, %c0_6] : memref<32x32xf32, #tpu.memory_space<vmem>>, vector<32x32xf32>
    %cst_7 = arith.constant dense<0.000000e+00> : vector<8x32xf32>
    %8 = tpu.matmul %6, %7, %cst_7 {dimension_numbers = #tpu.dot_dimension_numbers<[1], [0], [0], [1], [0, 0, 1, 1], [], []>} : vector<8x32xf32>, vector<32x32xf32>, vector<8x32xf32> -> vector<8x32xf32>
    %c0_8 = arith.constant 0 : index
    %c0_9 = arith.constant 0 : index
    %9 = vector.load %arg5[%c0_8, %c0_9] : memref<1x32xf32, #tpu.memory_space<vmem>>, vector<1x32xf32>
    %10 = vector.broadcast %9 : vector<1x32xf32> to vector<8x32xf32>
    %11 = arith.addf %8, %10 : vector<8x32xf32>
    %12 = math.tanh %11 : vector<8x32xf32>
    %c0_10 = arith.constant 0 : index
    %c0_11 = arith.constant 0 : index
    %13 = vector.load %arg6[%c0_10, %c0_11] : memref<1x32xf32, #tpu.memory_space<vmem>>, vector<1x32xf32>
    %14 = vector.broadcast %13 : vector<1x32xf32> to vector<8x32xf32>
    %15 = arith.mulf %12, %14 : vector<8x32xf32>
    %cst_12 = arith.constant dense<0.000000e+00> : vector<8xf32>
    %16 = vector.multi_reduction <add>, %15, %cst_12 [1] : vector<8x32xf32> to vector<8xf32>
    %c0_13 = arith.constant 0 : index
    %17 = memref.load %arg7[%c0_13] : memref<1xf32, #tpu.memory_space<smem>>
    %18 = vector.broadcast %17 : f32 to vector<8xf32>
    %19 = arith.addf %16, %18 : vector<8xf32>
    %20 = vector.shape_cast %19 : vector<8xf32> to vector<1x8xf32>
    %c0_14 = arith.constant 0 : index
    %c0_15 = arith.constant 0 : index
    %21 = vector.load %arg8[%c0_14, %c0_15] : memref<1x8xf32, #tpu.memory_space<vmem>>, vector<1x8xf32>
    tpu.vector_store %arg8[%c0_14, %c0_15], %20 {strides = array<i32>} : memref<1x8xf32, #tpu.memory_space<vmem>>, vector<1x8xf32>,
    return
  }
  func.func @transform_0(%arg0: i32) -> (i32, i32) {
    %c0_i32 = arith.constant 0 : i32
    %c0_i32_0 = arith.constant 0 : i32
    return %arg0, %c0_i32 : i32, i32
  }
  func.func @transform_1(%arg0: i32) -> (i32, i32) {
    %c0_i32 = arith.constant 0 : i32
    %c0_i32_0 = arith.constant 0 : i32
    %c0_i32_1 = arith.constant 0 : i32
    return %c0_i32, %c0_i32_0 : i32, i32
  }
  func.func @transform_2(%arg0: i32) -> (i32, i32) {
    %c0_i32 = arith.constant 0 : i32
    %c0_i32_0 = arith.constant 0 : i32
    %c0_i32_1 = arith.constant 0 : i32
    return %c0_i32, %c0_i32_0 : i32, i32
  }
  func.func @transform_3(%arg0: i32) -> (i32, i32) {
    %c0_i32 = arith.constant 0 : i32
    %c0_i32_0 = arith.constant 0 : i32
    %c0_i32_1 = arith.constant 0 : i32
    return %c0_i32, %c0_i32_0 : i32, i32
  }
  func.func @transform_4(%arg0: i32) -> (i32, i32) {
    %c0_i32 = arith.constant 0 : i32
    %c0_i32_0 = arith.constant 0 : i32
    %c0_i32_1 = arith.constant 0 : i32
    return %c0_i32, %c0_i32_0 : i32, i32
  }
  func.func @transform_5(%arg0: i32) -> (i32, i32) {
    %c0_i32 = arith.constant 0 : i32
    %c0_i32_0 = arith.constant 0 : i32
    %c0_i32_1 = arith.constant 0 : i32
    return %c0_i32, %c0_i32_0 : i32, i32
  }
  func.func @transform_6(%arg0: i32) -> i32 {
    %c0_i32 = arith.constant 0 : i32
    %c0_i32_0 = arith.constant 0 : i32
    return %c0_i32 : i32
  }
  func.func @transform_7(%arg0: i32) -> (i32, i32) {
    %c0_i32 = arith.constant 0 : i32
    %c0_i32_0 = arith.constant 0 : i32
    return %c0_i32, %arg0 : i32, i32
  }
}

</mosaic_0001>

<bundles_post_ra>
// kernel: discriminator_forward.1
= control target key start
LH: loop header
LB: loop body
LE: loop exit
PB: predicated region body
PF: predicated region fallthrough
CT: control target
= control target key end

     0   :  { %13 = vsyncpa [#allocation4], 0  ;;  %s498_s0 = inlined_call_operand.hbm [shape: f32[8,16], index: 0, kind: input, shape index: {}]   ;;  %s499_s1 = inlined_call_operand.vmem [shape: f32[16,32], index: 1, kind: input, shape index: {}]   ;;  %s500_s2 = inlined_call_operand.vmem [shape: f32[1,32], index: 2, kind: input, shape index: {}]   ;;  %s501_s3 = inlined_call_operand.hbm [shape: f32[32,32], index: 3, kind: input, shape index: {}]   ;;  %s502_s4 = inlined_call_operand.vmem [shape: f32[1,32], index: 4, kind: input, shape index: {}]   ;;  %s503_s5 = inlined_call_operand.vmem [shape: f32[1,32], index: 5, kind: input, shape index: {}]   ;;  %s504_s6 = inlined_call_operand.<no memory space> [shape: f32[1], index: 6, kind: input, shape index: {}]   ;;  %s505_s7 = inlined_call_operand.hbm [shape: f32[1,8], index: 7, kind: output, shape index: {}]  }
   0x1   :  { %14 = vsyncpa [#allocation7], 0 }
   0x2   :  { %15 = vsyncpa [#allocation5], 0  ;;  %s389_s24 = smov [#allocation3]   ;;  %s390_s26 = smov [#allocation6]  }
   0x3   :  { %s22_s25 = sshll.u32 %s389_s24, 4  ;;  %s35_s27 = sshll.u32 %s390_s26, 4  ;;  %s23_s25 = int_to_ptr.vmem [resolvable:$true] %s22_s25  ;;  %s437_s27 = int_to_ptr.vmem [resolvable:$true] %s35_s27 }
   0x4   :  { %s317_s30 = scalar_lea.hbm %s498_s0, 128 }
   0x5   :  { %p318_p0 = scmp.ne.s32.totalorder %s498_s0, %s317_s30  ;;  %p321_p1 = scmp.lt.u32.totalorder %s317_s30, %s498_s0 }
   0x7   :  { %p323_p2 = pnand %p321_p1, %p318_p0 }
   0x9   :  { %326 = shalt.err (!%p323_p2)
}
   0xa   :  { %s327_s12 = scalar_lea.vmem %s23_s25, 128  ;;  %p332_p4 = scmp.lt.s32.totalorder %s23_s25, %s23_s25 }
   0xb   :  { %p328_p3 = scmp.ne.s32.totalorder %s23_s25, %s327_s12  ;;  %p333_p5 = scmp.lt.s32.totalorder %s327_s12, %s327_s12 }
   0xd   :  { %p334_p6 = por %p333_p5, %p332_p4 }
   0xf   :  { %p335_p7 = pnand %p334_p6, %p328_p3 }
  0x11   :  { %338 = shalt.err (!%p335_p7)
}
  0x12   :  { %25 = dma.hbm_to_vmem [thread:$0]  %s498_s0, 128, %s23_s25, [#allocation4]  }
  0x13   :  { %s339_s17 = scalar_lea.hbm %s501_s3, 512 }
  0x14   :  { %p340_p8 = scmp.ne.s32.totalorder %s501_s3, %s339_s17  ;;  %p343_p9 = scmp.lt.u32.totalorder %s339_s17, %s501_s3 }
  0x16   :  { %p345_p10 = pnand %p343_p9, %p340_p8 }
  0x18   :  { %348 = shalt.err (!%p345_p10)
}
  0x19   :  { %s349_s22 = scalar_lea.vmem %s437_s27, 512  ;;  %p354_p12 = scmp.lt.s32.totalorder %s437_s27, %s437_s27 }
  0x1a   :  { %p350_p11 = scmp.ne.s32.totalorder %s437_s27, %s349_s22  ;;  %p355_p13 = scmp.lt.s32.totalorder %s349_s22, %s349_s22 }
  0x1c   :  { %p356_p0 = por %p355_p13, %p354_p12 }
  0x1e   :  { %p357_p1 = pnand %p356_p0, %p350_p11 }
  0x20   :  { %360 = shalt.err (!%p357_p1)
}
  0x21   :  { %s391_s0 = smov 128   ;;  %s392_s23 = smov 8  }
  0x22   :  { %41 = dma.hbm_to_vmem [thread:$0]  %s501_s3, 512, %s437_s27, [#allocation7], %s391_s0, %s391_s0, %s392_s23  }
  0x23   :  { %383 = dma.done.wait [#allocation4], 128  }
  0x24   :  { %384 = vsyncadd [#allocation4], 4294967168 }
  0x25   :  { %385 = dma.done.wait [#allocation7], 512  }
  0x26   :  { %386 = vsyncadd [#allocation7], 4294966784  ;;  %v393_v0 = vmov 0.0|0.0   ;;  %vm394_vm0 = vmmov 0   ;;  %v395_v1 = vmov 0.0   ;;  %v55_v2 = vld [vmem:[%s499_s1] sm:$0xff]  ;;  %v240_v25 = vlaneseq }
  0x27   :  { %296 = vmatprep.subr.bf16.mxu0 %v393_v0  ;;  %282 = vmatprep.mubr.msk.f32.mxu0 %vm394_vm0, %v395_v1  ;;  %v56_v3 = vld [vmem:[%s499_s1 + $0x8] sm:$0xff]  ;;  %v54_v5 = vld [vmem:[#allocation3] sm:$0xff]  ;;  %vm64_vm1 = vcmask 130048   ;;  %v140_v7 = vld [vmem:[#allocation6 + $0x8] sm:$0xff]  ;;  %vm150_vm2 = vcmask 261120   ;;  %v237_v28 = vstv %s504_s6  ;;  %vm247_vm3 = vcmask 57344  }
  0x28   :  { %299 = vmatprep.subr.bf16.mxu1 %v393_v0  ;;  %293 = vmatprep.mubr.msk.f32.mxu1 %vm394_vm0, %v395_v1  ;;  %v297_v4 = vpack.c.bf16 %v56_v3, %v55_v2  ;;  %v139_v6 = vld [vmem:[#allocation6] sm:$0xff]  ;;  %v141_v8 = vld [vmem:[#allocation6 + $0x10] sm:$0xff]  ;;  %v142_v10 = vld [vmem:[#allocation6 + $0x18] sm:$0xff]  ;;  %v241_v26 = vand.u32 127, %v240_v25  ;;  %v243_v27 = vshrl.u32 %v240_v25, 7 }
  0x29   :  { %v300_v9 = vpack.c.bf16 %v140_v7, %v139_v6  ;;  %v303_v11 = vpack.c.bf16 %v142_v10, %v141_v8  ;;  %v265_v12 = vld [vmem:[%s500_s2] ss:$0 sm:$0xff] }
  0x2a   :  { %298 = vmatpush3.bf16.msra.mxu0 %v297_v4  ;;  %v267_v17 = vld [vmem:[%s502_s4] ss:$0 sm:$0xff]  ;;  %v244_v29 = vsub.s32 %v241_v26, %v243_v27  ;;  %s396_s4 = smov [#allocation8]  }
  0x2b   :  { %301 = vmatpush3.bf16.msra.mxu1 %v300_v9  ;;  %v269_v21 = vld [vmem:[%s503_s5] ss:$0 sm:$0xff]  ;;  %s255_s12 = sshll.u32 %s396_s4, 4  ;;  %s256_s12 = int_to_ptr.vmem [resolvable:$true] %s255_s12 }
  0x2c   :  { %302 = vmatprep.subr.bf16.mxu1 %v393_v0  ;;  %s361_s5 = scalar_lea.vmem %s256_s12, 16  ;;  %s365_s13 = scalar_lea.vmem %s256_s12, 32 }
  0x2d   :  { %283 = vmatmul.mubr.msk.f32.vlgmr.msra.gmra.mrb[0].mxu0 %vm64_vm1, %v54_v5  ;;  %p362_p2 = scmp.ne.s32.totalorder %s256_s12, %s361_s5  ;;  %p366_p3 = scmp.lt.s32.totalorder %s256_s12, %s256_s12 }
  0x2e   :  { %p367_p4 = scmp.lt.s32.totalorder %s365_s13, %s361_s5 }
  0x2f   :  { %304 = vmatpush3.bf16.msra.mxu1 %v303_v11 }
  0x30   :  { %p368_p5 = por %p367_p4, %p366_p3 }
  0x32   :  { %p369_p6 = pnand %p368_p5, %p362_p2 }
 0x100   :  { %v134_v13 = vpop.f32.mrb[0].mxu0 }
 0x101   :  { %v135_v14 = vadd.f32 %v265_v12, %v134_v13  ;;  %v284_v15 = vpop.f32.mrb[1].mxu0 }
 0x103   :  { %313 = vtanh.f32 %v135_v14 }
 0x10d   :  { %v314_v16 = vpop.eup %313 }
 0x10e   :  { %294 = vmatmul.mubr.msk.f32.vlgmr.msra.gmra.mrb[0].mxu1 %vm150_vm2, %v314_v16 }
 0x1e1   :  { %v220_v18 = vpop.f32.mrb[0].mxu1 }
 0x1e2   :  { %v221_v19 = vadd.f32 %v267_v17, %v220_v18  ;;  %v295_v20 = vpop.f32.mrb[1].mxu1 }
 0x1e4   :  { %315 = vtanh.f32 %v221_v19 }
 0x1ee   :  { %v316_v22 = vpop.eup %315 }
 0x1ef   :  { %v232_v23 = vmul.f32 %v316_v22, %v269_v21 }
 0x1f1   :  { %v233_v24 = vsel %vm150_vm2, %v232_v23, 0.0 }
 0x1f2   :  { %234 = vadd.xlane.f32.xlu0 %v233_v24 }
 0x27f   :  { %v235_v30 = vpop.xlane.xlu0 %234 }
 0x280   :  { %v238_v31 = vadd.f32 %v237_v28, %v235_v30 }
 0x282   :  { %v245_v32 = vrot.slane %v238_v31, %v244_v29 }
 0x284   :  { %248 = vst.msk [vmem:[#allocation8] sm:$0x1] %vm247_vm3, %v245_v32 }
 0x285   :  { %372 = shalt.err (!%p369_p6)
}
 0x286   :  { %s373_s6 = scalar_lea.hbm %s505_s7, 16 }
 0x287   :  { %p374_p7 = scmp.ne.s32.totalorder %s505_s7, %s373_s6  ;;  %p377_p8 = scmp.lt.u32.totalorder %s373_s6, %s505_s7 }
 0x289   :  { %p379_p9 = pnand %p377_p8, %p374_p7 }
 0x28b   :  { %382 = shalt.err (!%p379_p9)
}
 0x28c   :  { %258 = dma.vmem_to_hbm [thread:$0]  %s256_s12, 16, %s505_s7, [#allocation5]  }
 0x28d   :  { %387 = dma.done.wait [#allocation5], 16  }
 0x28e   :  { %388 = vsyncadd [#allocation5], 4294967280 }
 0x28f   :  { %262 = vsyncpa [#allocation4], 1 }
 0x290   :  { %263 = vsyncpa [#allocation7], 1 }
 0x291   :  { %264 = vsyncpa [#allocation5], 1 }

</bundles_post_ra>
